<compile_context>
chip_gen: v7x
topology: tpu7x:2x2x1
jax: 0.10.0
libtpu: 0.0.40
codegen_flags: <defaults>
</compile_context>

<pallas_src>
import math

import jax
import jax.numpy as jnp
from jax.experimental import pallas as pl
from jax.experimental.pallas import tpu as pltpu


_LANES = 128
_SMALL_INPUT_BYTES = 1 << 20          # below this, fused XLA elementwise wins
_DIRECT_F_THRESHOLD = 512             # F this wide is already ~lane-dense
_MAX_ROW_BYTES = 256 * 1024           # cap on lane-dense flattened row width


def _sub_kernel(x_ref, c_ref, o_ref):
    # Pure VPU elementwise: out = x - c, c broadcast over rows (sublanes).
    o_ref[...] = x_ref[...] - c_ref[...]


def _tpu_vmem_bytes():
    # Generation-aware VMEM capacity (v5e/v6e: 128 MiB, v7x: 64 MiB per TC).
    try:
        return int(pltpu.get_tpu_info().vmem_capacity_bytes)
    except Exception:
        return 64 << 20  # conservative default (v7x per-TensorCore)


def _sublane_pack(itemsize):
    # Rows per sublane tile: 8 for f32, 16 for bf16/fp16, 32 for int8/fp8.
    return max(8, 32 // itemsize)


def _pick_row_tile(rows, row_bytes, block_budget, pack, min_steps=4):
    """Row tile: ~block_budget bytes/block, multiple of the dtype's sublane
    packing, and clamped so the grid keeps >= min_steps steps (pipeline depth
    + both v7x TensorCores on the "parallel" axis)."""
    if rows <= pack:
        return rows
    tm = max(1, block_budget // row_bytes)
    tm = min(tm, pl.cdiv(rows, min_steps))
    tm = min(tm, rows)
    tm = max(pack, (tm // pack) * pack)
    return tm


def _compiler_params(block_bytes, resident_bytes, vmem_total, *, semantics):
    # 2x double-buffered input blocks + 2x output blocks + the (possibly
    # double-buffered) resident c row + slack for Mosaic-internal scratch.
    need = 4 * block_bytes + 2 * resident_bytes + (4 << 20)
    limit = max(need, 32 << 20)
    limit = min(limit, vmem_total - (16 << 20))     # leave physical headroom
    return pltpu.CompilerParams(
        dimension_semantics=semantics,
        vmem_limit_bytes=int(limit),
    )


def standardizer_features_forward(x, mu, sigma, *,
                                  min_pallas_bytes=_SMALL_INPUT_BYTES):
    """forward(x) = x - mu / sigma  (exact PyTorch operator precedence).

    x: (N, F); mu, sigma: (F,). Returns (N, F) in x.dtype.
    Pass min_pallas_bytes=0 to force the Pallas path even for tiny inputs.
    """
    n, f = x.shape
    itemsize = jnp.dtype(x.dtype).itemsize
    total = n * f

    # Loop-invariant correction, computed once in f32, cast once to x.dtype.
    # TODO(synk): the PyTorch module almost certainly intended (x - mu)/sigma;
    # we intentionally keep the original operator precedence.
    c = (mu.astype(jnp.float32) / sigma.astype(jnp.float32)).astype(x.dtype)

    # 1) Tiny inputs: launch + wrapper plumbing dominates; fused XLA wins.
    if total * itemsize < min_pallas_bytes:
        return x - c[None, :]

    vmem_total = _tpu_vmem_bytes()
    block_budget = min(8 << 20, vmem_total // 10)  # ~8 MiB v5e/v6e, ~6.4 MiB v7x
    pack = _sublane_pack(itemsize)

    # 2) F already lane-dense (multiple of 128, or wide enough that the masked
    #    tail of the last 128-lane chunk is negligible): block (N, F) directly.
    if f % _LANES == 0 or f >= _DIRECT_F_THRESHOLD:
        row_bytes = f * itemsize
        if row_bytes * pack <= block_budget:
            tf = f
        else:
            tf = max(_LANES,
                     ((block_budget // (pack * itemsize)) // _LANES) * _LANES)
            tf = min(tf, f)
        tm = _pick_row_tile(n, tf * itemsize, block_budget, pack)
        return pl.pallas_call(
            _sub_kernel,
            out_shape=jax.ShapeDtypeStruct((n, f), x.dtype),
            grid_spec=pltpu.PrefetchScalarGridSpec(
                num_scalar_prefetch=0,
                grid=(pl.cdiv(n, tm), pl.cdiv(f, tf)),
                in_specs=[
                    pl.BlockSpec((tm, tf), lambda i, j: (i, j)),
                    pl.BlockSpec((1, tf), lambda i, j: (0, j)),
                ],
                out_specs=pl.BlockSpec((tm, tf), lambda i, j: (i, j)),
            ),
            compiler_params=_compiler_params(
                tm * tf * itemsize, tf * itemsize, vmem_total,
                semantics=("parallel", "parallel")),
        )(x, c.reshape(1, f))

    # 3) Small / awkward F: flatten to lane-dense rows of width L = lcm(F,128)
    #    so every vector store is a full, unmasked vst.  The reshape is pure
    #    metadata (no pad, no slice) exactly when N*F is a multiple of L.
    L = f * (_LANES // math.gcd(f, _LANES))      # lcm(F, 128)
    if total % L == 0 and L * itemsize <= _MAX_ROW_BYTES:
        rows = total // L
        x2 = x.reshape(rows, L)
        c_row = jnp.tile(c, L // f).reshape(1, L)   # c[j % F] along the lanes
        tm = _pick_row_tile(rows, L * itemsize, block_budget, pack)
        out2 = pl.pallas_call(
            _sub_kernel,
            out_shape=jax.ShapeDtypeStruct((rows, L), x.dtype),
            grid_spec=pltpu.PrefetchScalarGridSpec(
                num_scalar_prefetch=0,
                grid=(pl.cdiv(rows, tm),),
                in_specs=[
                    pl.BlockSpec((tm, L), lambda i: (i, 0)),
                    pl.BlockSpec((1, L), lambda i: (0, 0)),
                ],
                out_specs=pl.BlockSpec((tm, L), lambda i: (i, 0)),
            ),
            compiler_params=_compiler_params(
                tm * L * itemsize, L * itemsize, vmem_total,
                semantics=("parallel",)),
        )(x2, c_row)
        return out2.reshape(n, f)

    # 4) Ragged tail (N*F not a multiple of 128) with narrow F: any Pallas
    #    formulation here needs either an HBM pad + output slice (>= 2 extra
    #    full passes over the data) or lane-sparse masked stores; the fused
    #    XLA elementwise subtract is cheaper, so defer to it.
    # TODO(synk): revisit with a flat 1-D BlockSpec (auto-masked last block)
    # if Mosaic's 1-D vector layout proves efficient for large blocks.
    return x - c[None, :]


if __name__ == "__main__":
    key = jax.random.PRNGKey(0)

    def fit(xf):
        # Mirrors StandardizerFeatures.fit (torch.std uses ddof=1).
        mu = jnp.mean(xf, axis=0)
        sigma = jnp.std(xf, axis=0, ddof=1)
        sigma = jnp.where(sigma == 0, 1e-12, sigma)
        return mu, sigma

    def check(x, *, force_pallas=True):
        mu32, sigma32 = fit(x.astype(jnp.float32))
        mu = mu32.astype(x.dtype)
        sigma = sigma32.astype(x.dtype)
        out = standardizer_features_forward(
            x, mu, sigma,
            min_pallas_bytes=0 if force_pallas else _SMALL_INPUT_BYTES)
        out = jax.block_until_ready(out)
        c = (mu.astype(jnp.float32) / sigma.astype(jnp.float32)).astype(x.dtype)
        ref = x - c[None, :]
        assert out.shape == x.shape and out.dtype == x.dtype
        tol = 1e-6 if x.dtype == jnp.float32 else 1e-2
        assert jnp.allclose(out.astype(jnp.float32), ref.astype(jnp.float32),
                            atol=tol, rtol=tol), (x.shape, str(x.dtype))

    k1, k2, k3, k4, k5 = jax.random.split(key, 5)

    # Module default n_feats=2 -> lane-dense flattened path (single step).
    check(jax.random.normal(k1, (256, 2), jnp.float32) * 3.0 + 1.5)
    # Multi-step grid on the lane-dense path.
    check(jax.random.normal(k2, (1024, 2), jnp.float32) * 2.0 - 0.5)
    # bf16: exercises sublane-packing-aware (multiple of 16) row tiles.
    check(jax.random.normal(k3, (4096, 2), jnp.float32).astype(jnp.bfloat16))
    # Wide feature dim: direct (N, F)-blocked path, 2-D grid.
    check(jax.random.normal(k4, (16, 256), jnp.float32))
    # Ragged small-F input: routed to the fused XLA elementwise path.
    check(jax.random.normal(k5, (10, 3), jnp.float32))

    print("KERNEL_OK")
</pallas_src>

<mosaic_0001>
module attributes {stable_mosaic.version = 11 : i64} {
  func.func @_sub_kernel(%arg0: i32, %arg1: memref<4x128xf32, #tpu.memory_space<vmem>>, %arg2: memref<1x128xf32, #tpu.memory_space<vmem>>, %arg3: memref<4x128xf32, #tpu.memory_space<vmem>>) attributes {dimension_semantics = [#tpu.dimension_semantics<parallel>], iteration_bounds = array<i64: 1>, scalar_prefetch = 0 : i64, scratch_operands = 0 : i64, tpu.core_type = #tpu.core_type<tc>, window_params = [{transform_indices = @transform_0, window_bounds = array<i64: 4, 128>}, {pipeline_mode = #tpu.pipeline_mode<synchronous>, transform_indices = @transform_1, window_bounds = array<i64: 1, 128>}, {transform_indices = @transform_2, window_bounds = array<i64: 4, 128>}]} {
    %c0 = arith.constant 0 : index
    %c0_0 = arith.constant 0 : index
    %0 = vector.load %arg1[%c0, %c0_0] : memref<4x128xf32, #tpu.memory_space<vmem>>, vector<4x128xf32>
    %c0_1 = arith.constant 0 : index
    %c0_2 = arith.constant 0 : index
    %1 = vector.load %arg2[%c0_1, %c0_2] : memref<1x128xf32, #tpu.memory_space<vmem>>, vector<1x128xf32>
    %2 = vector.broadcast %1 : vector<1x128xf32> to vector<4x128xf32>
    %3 = arith.subf %0, %2 : vector<4x128xf32>
    %c0_3 = arith.constant 0 : index
    %c0_4 = arith.constant 0 : index
    %4 = vector.load %arg3[%c0_3, %c0_4] : memref<4x128xf32, #tpu.memory_space<vmem>>, vector<4x128xf32>
    tpu.vector_store %arg3[%c0_3, %c0_4], %3 {strides = array<i32>} : memref<4x128xf32, #tpu.memory_space<vmem>>, vector<4x128xf32>,
    return
  }
  func.func @transform_0(%arg0: i32) -> (i32, i32) {
    %c0_i32 = arith.constant 0 : i32
    %c0_i32_0 = arith.constant 0 : i32
    return %arg0, %c0_i32 : i32, i32
  }
  func.func @transform_1(%arg0: i32) -> (i32, i32) {
    %c0_i32 = arith.constant 0 : i32
    %c0_i32_0 = arith.constant 0 : i32
    %c0_i32_1 = arith.constant 0 : i32
    return %c0_i32, %c0_i32_0 : i32, i32
  }
  func.func @transform_2(%arg0: i32) -> (i32, i32) {
    %c0_i32 = arith.constant 0 : i32
    %c0_i32_0 = arith.constant 0 : i32
    return %arg0, %c0_i32 : i32, i32
  }
}

</mosaic_0001>

<bundles_post_ra>
// kernel: tpu_custom_call.1
= control target key start
LH: loop header
LB: loop body
LE: loop exit
PB: predicated region body
PF: predicated region fallthrough
CT: control target
= control target key end

     0   :  { %7 = vsyncpa [#allocation3], 0  ;;  %s144_s0 = inlined_call_operand.hbm [shape: f32[4,128], index: 0, kind: input, shape index: {}]   ;;  %s145_s1 = inlined_call_operand.vmem [shape: f32[1,128], index: 1, kind: input, shape index: {}]   ;;  %s146_s2 = inlined_call_operand.hbm [shape: f32[4,128], index: 2, kind: output, shape index: {}]  }
   0x1   :  { %8 = vsyncpa [#allocation4], 0  ;;  %s100_s9 = smov [#allocation2]   ;;  %s52_s13 = scalar_lea.hbm %s144_s0, 64 }
   0x2   :  { %s15_s10 = sshll.u32 %s100_s9, 4  ;;  %p53_p0 = scmp.ne.s32.totalorder %s144_s0, %s52_s13  ;;  %s16_s10 = int_to_ptr.vmem [resolvable:$true] %s15_s10 }
   0x3   :  { %p56_p1 = scmp.lt.u32.totalorder %s52_s13, %s144_s0 }
   0x5   :  { %p58_p2 = pnand %p56_p1, %p53_p0 }
   0x7   :  { %61 = shalt.err (!%p58_p2)
}
   0x8   :  { %s62_s18 = scalar_lea.vmem %s16_s10, 64  ;;  %p67_p4 = scmp.lt.s32.totalorder %s16_s10, %s16_s10 }
   0x9   :  { %p63_p3 = scmp.ne.s32.totalorder %s16_s10, %s62_s18  ;;  %p68_p5 = scmp.lt.s32.totalorder %s62_s18, %s62_s18 }
   0xb   :  { %p69_p6 = por %p68_p5, %p67_p4 }
   0xd   :  { %p70_p7 = pnand %p69_p6, %p63_p3 }
   0xf   :  { %73 = shalt.err (!%p70_p7)
}
  0x10   :  { %18 = dma.hbm_to_vmem [thread:$0]  %s144_s0, 64, %s16_s10, [#allocation3]  }
  0x11   :  { %96 = dma.done.wait [#allocation3], 64  }
  0x12   :  { %97 = vsyncadd [#allocation3], 4294967232  ;;  %s101_s21 = smov [#allocation5]   ;;  %v24_v0 = vld [vmem:[#allocation2] sm:$0xf] }
  0x13   :  { %s40_s22 = sshll.u32 %s101_s21, 4  ;;  %v49_v1 = vld [vmem:[%s145_s1] ss:$0 sm:$0xff]  ;;  %s41_s22 = int_to_ptr.vmem [resolvable:$true] %s40_s22 }
  0x14   :  { %v32_v2 = vsub.f32 %v24_v0, %v49_v1  ;;  %s74_s25 = scalar_lea.vmem %s41_s22, 64  ;;  %p79_p9 = scmp.lt.s32.totalorder %s41_s22, %s41_s22 }
  0x15   :  { %p75_p8 = scmp.ne.s32.totalorder %s41_s22, %s74_s25  ;;  %p80_p10 = scmp.lt.s32.totalorder %s74_s25, %s74_s25 }
  0x16   :  { %33 = vst [vmem:[#allocation5] sm:$0xf] %v32_v2 }
  0x17   :  { %p81_p11 = por %p80_p10, %p79_p9 }
  0x19   :  { %p82_p12 = pnand %p81_p11, %p75_p8 }
  0x1b   :  { %85 = shalt.err (!%p82_p12)
}
  0x1c   :  { %s86_s27 = scalar_lea.hbm %s146_s2, 64 }
  0x1d   :  { %p87_p13 = scmp.ne.s32.totalorder %s146_s2, %s86_s27  ;;  %p90_p0 = scmp.lt.u32.totalorder %s86_s27, %s146_s2 }
  0x1f   :  { %p92_p1 = pnand %p90_p0, %p87_p13 }
  0x21   :  { %95 = shalt.err (!%p92_p1)
}
  0x22   :  { %43 = dma.vmem_to_hbm [thread:$0]  %s41_s22, 64, %s146_s2, [#allocation4]  }
  0x23   :  { %98 = dma.done.wait [#allocation4], 64  }
  0x24   :  { %99 = vsyncadd [#allocation4], 4294967232 }
  0x25   :  { %47 = vsyncpa [#allocation3], 1 }
  0x26   :  { %48 = vsyncpa [#allocation4], 1 }

</bundles_post_ra>
